<compile_context>
chip_gen: v7x
topology: tpu7x:2x2x1
jax: 0.10.0
libtpu: 0.0.40
codegen_flags: <defaults>
</compile_context>

<pallas_src>
import functools

import jax
import jax.numpy as jnp
import numpy as np
from jax.experimental import pallas as pl
from jax.experimental.pallas import tpu as pltpu


def _dice_sums_kernel(x_ref, lab_ref, out_ref, acc_ref, *, spatial_size, tile_n):
    """One (batch b, spatial tile t) grid step.

    x_ref:   (C, tile_n) native-dtype predictions tile (channel-major view)
    lab_ref: (1, tile_n) int32 labels tile
    out_ref: (C, 3)      per-batch [intersect, outputs_sum, labels_sum]
    acc_ref: (C, 3) f32  VMEM accumulator, resident across the tile axis
    """
    t = pl.program_id(1)

    @pl.when(t == 0)
    def _():
        acc_ref[...] = jnp.zeros_like(acc_ref)

    x = x_ref[...].astype(jnp.float32)                 # (C, tn)
    lab = lab_ref[...]                                 # (1, tn) int32
    C, tn = x.shape

    # Mask the ragged last tile (block may overhang the true spatial size S).
    col = jax.lax.broadcasted_iota(jnp.int32, (1, tn), 1) + t * tile_n
    valid = col < spatial_size                         # (1, tn) bool

    class_ids = jax.lax.broadcasted_iota(jnp.int32, (C, tn), 0)
    onehot = jnp.logical_and(lab == class_ids, valid)  # (C, tn) bool

    x_valid = jnp.where(valid, x, 0.0)                 # (C, tn)

    inter = jnp.sum(jnp.where(onehot, x, 0.0), axis=1, keepdims=True)   # (C, 1)
    osum = jnp.sum(x_valid * x_valid, axis=1, keepdims=True)            # (C, 1)
    lsum = jnp.sum(onehot.astype(jnp.float32), axis=1, keepdims=True)   # (C, 1)

    # One fused accumulate per grid step (instead of 3 narrow column RMWs).
    acc_ref[...] += jnp.concatenate([inter, osum, lsum], axis=1)        # (C, 3)

    @pl.when(t == pl.num_programs(1) - 1)
    def _():
        out_ref[...] = acc_ref[...]


def _pick_tile(spatial, tile_n):
    tile_n = max(128, (int(tile_n) // 128) * 128)
    # A block equal to the full (last) array dim is always legal; otherwise
    # keep a multiple of 128 and let in-kernel masking handle the ragged tail.
    return spatial if spatial <= tile_n else tile_n


@functools.partial(jax.jit, static_argnames=("num_class", "smooth", "tile_n"))
def dice_loss(outputs, label, *, num_class=33, smooth=1e-5, tile_n=8192):
    """outputs: (B, num_class, *spatial) float; label: (B, *spatial) int."""
    B, C = outputs.shape[0], outputs.shape[1]
    assert C == num_class
    S = int(np.prod(outputs.shape[2:]))

    x = outputs.reshape(B, C, S)                       # free view, native dtype
    lab = label.reshape(B, 1, S).astype(jnp.int32)     # tiny relative to x

    tn = _pick_tile(S, tile_n)
    num_tiles = pl.cdiv(S, tn)

    kernel = functools.partial(_dice_sums_kernel, spatial_size=S, tile_n=tn)

    bytes_accessed = x.size * x.dtype.itemsize + lab.size * 4 + B * C * 3 * 4
    cost = pl.CostEstimate(flops=6 * B * C * S, transcendentals=0,
                           bytes_accessed=bytes_accessed)

    sums = pl.pallas_call(
        kernel,
        out_shape=jax.ShapeDtypeStruct((B, C, 3), jnp.float32),
        grid_spec=pltpu.PrefetchScalarGridSpec(
            num_scalar_prefetch=0,
            grid=(B, num_tiles),
            in_specs=[
                pl.BlockSpec((None, C, tn), lambda b, t: (b, 0, t)),
                pl.BlockSpec((None, 1, tn), lambda b, t: (b, 0, t)),
            ],
            out_specs=pl.BlockSpec((None, C, 3), lambda b, t: (b, 0, 0)),
            scratch_shapes=[pltpu.VMEM((C, 3), jnp.float32)],
        ),
        compiler_params=pltpu.CompilerParams(
            dimension_semantics=("parallel", "arbitrary"),
            vmem_limit_bytes=32 * 1024 * 1024,
        ),
        cost_estimate=cost,
    )(x, lab)

    totals = jnp.sum(sums, axis=0)                     # (C, 3): reduce over batch
    intersect = totals[:, 0]
    outputs_sum = totals[:, 1]
    labels_sum = totals[:, 2]
    dice = (2.0 * intersect + smooth) / (outputs_sum + labels_sum + smooth)
    return jnp.mean(1.0 - dice)


def _dice_loss_ref(outputs, label, num_class=33, smooth=1e-5):
    """Pure-JAX reference mirroring the PyTorch forward."""
    outputs = outputs.astype(jnp.float32)
    onehot = jax.nn.one_hot(label, num_class, axis=1, dtype=jnp.float32)
    axes = (0,) + tuple(range(2, outputs.ndim))
    intersect = jnp.sum(outputs * onehot, axis=axes)
    outputs_sum = jnp.sum(outputs * outputs, axis=axes)
    labels_sum = jnp.sum(onehot * onehot, axis=axes)
    dice = (2.0 * intersect + smooth) / (outputs_sum + labels_sum + smooth)
    return jnp.mean(1.0 - dice)


if __name__ == "__main__":
    key = jax.random.PRNGKey(0)
    k0, k1, k2, k3 = jax.random.split(key, 4)

    # 2-D segmentation case: (B, C, H, W), module default num_class.
    NUM_CLASS = 33
    B, H, W = 2, 16, 16
    outputs4 = jax.random.uniform(k0, (B, NUM_CLASS, H, W), dtype=jnp.float32)
    label4 = jax.random.randint(k1, (B, H, W), 0, NUM_CLASS, dtype=jnp.int32)

    loss4 = jax.block_until_ready(dice_loss(outputs4, label4, num_class=NUM_CLASS))
    ref4 = _dice_loss_ref(outputs4, label4, num_class=NUM_CLASS)
    np.testing.assert_allclose(np.asarray(loss4), np.asarray(ref4),
                               rtol=1e-5, atol=1e-6)

    # 3-D segmentation case with a ragged spatial size (exercises the in-kernel
    # tail mask and the multi-tile reduction): S = 7*9*11 = 693.
    NC3 = 5
    B3, D3, H3, W3 = 2, 7, 9, 11
    outputs5 = jax.random.uniform(k2, (B3, NC3, D3, H3, W3), dtype=jnp.float32)
    label5 = jax.random.randint(k3, (B3, D3, H3, W3), 0, NC3, dtype=jnp.int32)

    loss5 = jax.block_until_ready(
        dice_loss(outputs5, label5, num_class=NC3, tile_n=128))
    ref5 = _dice_loss_ref(outputs5, label5, num_class=NC3)
    np.testing.assert_allclose(np.asarray(loss5), np.asarray(ref5),
                               rtol=1e-5, atol=1e-6)

    print("KERNEL_OK")
</pallas_src>

<mosaic_0001>
module attributes {stable_mosaic.version = 11 : i64} {
  func.func @_dice_sums_kernel(%arg0: i32, %arg1: i32, %arg2: memref<1x33x256xf32, #tpu.memory_space<vmem>>, %arg3: memref<1x1x256xi32, #tpu.memory_space<vmem>>, %arg4: memref<1x33x3xf32, #tpu.memory_space<vmem>>, %arg5: memref<33x3xf32, #tpu.memory_space<vmem>>) attributes {dimension_semantics = [#tpu.dimension_semantics<parallel>, #tpu.dimension_semantics<arbitrary>], iteration_bounds = array<i64: 2, 1>, scalar_prefetch = 0 : i64, scratch_operands = 1 : i64, tpu.core_type = #tpu.core_type<tc>, window_params = [{transform_indices = @transform_0, window_bounds = array<i64: 1, 33, 256>}, {transform_indices = @transform_1, window_bounds = array<i64: 1, 1, 256>}, {transform_indices = @transform_2, window_bounds = array<i64: 1, 33, 3>}]} {
    %c0_i32 = arith.constant 0 : i32
    %0 = arith.cmpi eq, %arg1, %c0_i32 : i32
    %1 = arith.extui %0 : i1 to i32
    %c0_i32_0 = arith.constant 0 : i32
    %2 = arith.cmpi ne, %1, %c0_i32_0 : i32
    scf.if %2 {
      %cst_17 = arith.constant 0.000000e+00 : f32
      %40 = vector.broadcast %cst_17 : f32 to vector<33x3xf32>
      %c0_18 = arith.constant 0 : index
      %c0_19 = arith.constant 0 : index
      %41 = vector.load %arg5[%c0_18, %c0_19] : memref<33x3xf32, #tpu.memory_space<vmem>>, vector<33x3xf32>
      tpu.vector_store %arg5[%c0_18, %c0_19], %40 {strides = array<i32>} : memref<33x3xf32, #tpu.memory_space<vmem>>, vector<33x3xf32>,
    } else {
    }
    %c0 = arith.constant 0 : index
    %c0_1 = arith.constant 0 : index
    %c0_2 = arith.constant 0 : index
    %3 = vector.load %arg2[%c0, %c0_1, %c0_2] : memref<1x33x256xf32, #tpu.memory_space<vmem>>, vector<1x33x256xf32>
    %4 = vector.shape_cast %3 : vector<1x33x256xf32> to vector<33x256xf32>
    %c0_3 = arith.constant 0 : index
    %c0_4 = arith.constant 0 : index
    %c0_5 = arith.constant 0 : index
    %5 = vector.load %arg3[%c0_3, %c0_4, %c0_5] : memref<1x1x256xi32, #tpu.memory_space<vmem>>, vector<1x1x256xi32>
    %6 = vector.shape_cast %5 : vector<1x1x256xi32> to vector<1x256xi32>
    %7 = tpu.iota {dimensions = array<i32: 1>} : vector<1x256xi32>
    %c256_i32 = arith.constant 256 : i32
    %8 = arith.muli %arg1, %c256_i32 : i32
    %9 = vector.broadcast %8 : i32 to vector<1x256xi32>
    %10 = arith.addi %7, %9 : vector<1x256xi32>
    %c256_i32_6 = arith.constant 256 : i32
    %11 = vector.broadcast %c256_i32_6 : i32 to vector<1x256xi32>
    %12 = arith.cmpi slt, %10, %11 : vector<1x256xi32>
    %13 = tpu.iota {dimensions = array<i32: 0>} : vector<33x256xi32>
    %14 = vector.broadcast %6 : vector<1x256xi32> to vector<33x256xi32>
    %15 = arith.cmpi eq, %14, %13 : vector<33x256xi32>
    %16 = vector.broadcast %12 : vector<1x256xi1> to vector<33x256xi1>
    %17 = arith.andi %15, %16 : vector<33x256xi1>
    %cst = arith.constant 0.000000e+00 : f32
    %18 = vector.shape_cast %12 : vector<1x256xi1> to vector<1x256xi1>
    %19 = vector.broadcast %18 : vector<1x256xi1> to vector<33x256xi1>
    %20 = vector.broadcast %cst : f32 to vector<33x256xf32>
    %21 = arith.select %19, %4, %20 : vector<33x256xi1>, vector<33x256xf32>
    %cst_7 = arith.constant 0.000000e+00 : f32
    %22 = vector.broadcast %cst_7 : f32 to vector<33x256xf32>
    %23 = arith.select %17, %4, %22 : vector<33x256xi1>, vector<33x256xf32>
    %cst_8 = arith.constant dense<0.000000e+00> : vector<33xf32>
    %24 = vector.multi_reduction <add>, %23, %cst_8 [1] : vector<33x256xf32> to vector<33xf32>
    %25 = vector.shape_cast %24 : vector<33xf32> to vector<33x1xf32>
    %26 = arith.mulf %21, %21 : vector<33x256xf32>
    %cst_9 = arith.constant dense<0.000000e+00> : vector<33xf32>
    %27 = vector.multi_reduction <add>, %26, %cst_9 [1] : vector<33x256xf32> to vector<33xf32>
    %28 = vector.shape_cast %27 : vector<33xf32> to vector<33x1xf32>
    %29 = arith.extui %17 : vector<33x256xi1> to vector<33x256xi32>
    %30 = arith.sitofp %29 : vector<33x256xi32> to vector<33x256xf32>
    %cst_10 = arith.constant dense<0.000000e+00> : vector<33xf32>
    %31 = vector.multi_reduction <add>, %30, %cst_10 [1] : vector<33x256xf32> to vector<33xf32>
    %32 = vector.shape_cast %31 : vector<33xf32> to vector<33x1xf32>
    %c0_11 = arith.constant 0 : index
    %c0_12 = arith.constant 0 : index
    %33 = vector.load %arg5[%c0_11, %c0_12] : memref<33x3xf32, #tpu.memory_space<vmem>>, vector<33x3xf32>
    %34 = tpu.concatenate %25, %28, %32 in 1 : vector<33x1xf32>, vector<33x1xf32>, vector<33x1xf32> -> vector<33x3xf32>
    %35 = arith.addf %33, %34 : vector<33x3xf32>
    %c0_13 = arith.constant 0 : index
    %c0_14 = arith.constant 0 : index
    %36 = vector.load %arg5[%c0_13, %c0_14] : memref<33x3xf32, #tpu.memory_space<vmem>>, vector<33x3xf32>
    tpu.vector_store %arg5[%c0_13, %c0_14], %35 {strides = array<i32>} : memref<33x3xf32, #tpu.memory_space<vmem>>, vector<33x3xf32>,
    %c0_i32_15 = arith.constant 0 : i32
    %37 = arith.cmpi eq, %arg1, %c0_i32_15 : i32
    %38 = arith.extui %37 : i1 to i32
    %c0_i32_16 = arith.constant 0 : i32
    %39 = arith.cmpi ne, %38, %c0_i32_16 : i32
    scf.if %39 {
      %c0_17 = arith.constant 0 : index
      %c0_18 = arith.constant 0 : index
      %40 = vector.load %arg5[%c0_17, %c0_18] : memref<33x3xf32, #tpu.memory_space<vmem>>, vector<33x3xf32>
      %c0_19 = arith.constant 0 : index
      %c0_20 = arith.constant 0 : index
      %c0_21 = arith.constant 0 : index
      %41 = vector.load %arg4[%c0_19, %c0_20, %c0_21] : memref<1x33x3xf32, #tpu.memory_space<vmem>>, vector<1x33x3xf32>
      %42 = vector.shape_cast %41 : vector<1x33x3xf32> to vector<33x3xf32>
      %43 = vector.shape_cast %40 : vector<33x3xf32> to vector<1x33x3xf32>
      tpu.vector_store %arg4[%c0_19, %c0_20, %c0_21], %43 {strides = array<i32>} : memref<1x33x3xf32, #tpu.memory_space<vmem>>, vector<1x33x3xf32>,
    } else {
    }
    return
  }
  func.func @transform_0(%arg0: i32, %arg1: i32) -> (i32, i32, i32) {
    %c0_i32 = arith.constant 0 : i32
    %c0_i32_0 = arith.constant 0 : i32
    return %arg0, %c0_i32, %arg1 : i32, i32, i32
  }
  func.func @transform_1(%arg0: i32, %arg1: i32) -> (i32, i32, i32) {
    %c0_i32 = arith.constant 0 : i32
    %c0_i32_0 = arith.constant 0 : i32
    return %arg0, %c0_i32, %arg1 : i32, i32, i32
  }
  func.func @transform_2(%arg0: i32, %arg1: i32) -> (i32, i32, i32) {
    %c0_i32 = arith.constant 0 : i32
    %c0_i32_0 = arith.constant 0 : i32
    %c0_i32_1 = arith.constant 0 : i32
    return %arg0, %c0_i32, %c0_i32_0 : i32, i32, i32
  }
}

</mosaic_0001>

<bundles_post_ra>
// kernel: dice_loss.1
= control target key start
LH: loop header
LB: loop body
LE: loop exit
PB: predicated region body
PF: predicated region fallthrough
CT: control target
= control target key end

     0   :  { %s589_s9 = smov 0   ;;  %s591_s10 = smov 0   ;;  %s773_s0 = inlined_call_operand.vmem [shape: f32[2,33,256], index: 0, kind: input, shape index: {}]   ;;  %s774_s1 = inlined_call_operand.vmem [shape: s32[2,1,256], index: 1, kind: input, shape index: {}]   ;;  %s775_s2 = inlined_call_operand.vmem [shape: f32[2,33,3], index: 2, kind: output, shape index: {}]  }
   0x1   :  { %s593_s11 = smov 0  }
   0x2 LB: > { %s24_s12 = sadd.s32 1, %s567_s10  ;;  %p506_p0 = scmp.ge.s32.totalorder %s571_s11, 1  ;;  %s571_s11 = sphi %s593_s11, %s12_s11   ;;  %s567_s10 = sphi %s591_s10, %s777_s10   ;;  %s563_s9 = sphi %s589_s9, %s776_s9  }
   0x3   : > { %p26_p1 = scmp.ge.s32.totalorder %s24_s12, 2  ;;  %p147_p2 = scmp.lt.s32.totalorder %s571_s11, 3 }
   0x5   : > { %s779_s12 = smov (%p26_p1, %s24_s12), 0  ;;  %p148_p3 = pnand %p506_p0, %p147_p2 }
   0x6   : > { %p182_p4 = scmp.lt.s32.totalorder (!%p148_p3), %s563_s9, 1  ;;  %v236_v0 = vlaneseq (!%p148_p3)  ;;  %vm306_vm6 = vcmask (!%p148_p3), 1040384   ;;  %v573_v55 = vmov (!%p148_p3), 0.0   ;;  %vm209_vm11 = vcmask (!%p148_p3), 23552  }
   0x7   : > { %151 = sbr.rel (%p148_p3) target bundleno = 206 (0xce), region = 28  ;;  %211 = vst.msk [vmem:[#allocation2 + $0x8] sm:$0xff] (!%p148_p3), %vm209_vm11, %v573_v55  ;;  %210 = vst.msk [vmem:[#allocation2] sm:$0xff] (!%p148_p3), %vm209_vm11, %v573_v55  ;;  %vm214_vm12 = vcmask (!%p148_p3), 16384   ;;  %vm381_vm13 = vcmask (!%p148_p3), 7168   ;;  %vm387_vm14 = vcmask (!%p148_p3), 15360  }
   0x8   : > { %v609_v1 = vshrl.u32 (!%p148_p3), %v236_v0, 7  ;;  %212 = vst.msk [vmem:[#allocation2 + $0x10] sm:$0xff] (!%p148_p3), %vm209_vm11, %v573_v55  ;;  %213 = vst.msk [vmem:[#allocation2 + $0x18] sm:$0xff] (!%p148_p3), %vm209_vm11, %v573_v55 }
   0x9   : > { %215 = vst.msk [vmem:[#allocation2 + $0x20] sm:$0x1] (!%p148_p3), %vm214_vm12, %v573_v55 }
   0xa   : > { %v244_v2 = vsub.s32 (!%p148_p3), 0, %v609_v1  ;;  %v248_v3 = vsub.s32 (!%p148_p3), 1, %v609_v1  ;;  %v631_v10 = vadd.s32 (!%p148_p3), 16, %v609_v1  ;;  %v634_v11 = vadd.s32 (!%p148_p3), 8, %v609_v1 }
   0xb   : > { %v640_v18 = vadd.s32 (!%p148_p3), 24, %v609_v1  ;;  %v650_v24 = vadd.s32 (!%p148_p3), 32, %v609_v1 }
   0xe   : > { %s781_s9 = smov (!%p182_p4, %s563_s9), 1 }
   0xf   : > { %s522_s13 = smul.u32 80, %s781_s9  ;;  %s508_s14 = sshll.u32 %s781_s9, 1 }
  0x10   : > { %s198_s17 = scalar_lea.vmem %s774_s1, %s508_s14  ;;  %s523_s21 = smul.u32 40, %s781_s9 }
  0x11   : > { %s621_s20 = scalar_lea.vmem %s773_s0, %s522_s13  ;;  %v226_v4 = vld [vmem:[%s198_s17] sm:$0x3] }
  0x12   : > { %v218_v5 = vld [vmem:[%s621_s20 + $0x10] sm:$0xff]  ;;  %v219_v6 = vld [vmem:[%s621_s20 + $0x18] sm:$0xff]  ;;  %v216_v7 = vld [vmem:[%s621_s20] sm:$0xff]  ;;  %v626_v8 = vrot.slane %v226_v4, %v244_v2  ;;  %v628_v9 = vrot.slane %v226_v4, %v248_v3  ;;  %s204_s24 = scalar_lea.vmem %s775_s2, %s523_s21 }
  0x13   : > { %v314_v12 = vmul.f32 %v218_v5, %v218_v5  ;;  %v315_v13 = vmul.f32 %v219_v6, %v219_v6  ;;  %v217_v14 = vld [vmem:[%s621_s20 + $0x8] sm:$0xff]  ;;  %v312_v15 = vmul.f32 %v216_v7, %v216_v7  ;;  %v220_v16 = vld [vmem:[%s621_s20 + $0x20] sm:$0xff]  ;;  %v222_v35 = vld [vmem:[%s621_s20 + $0x30] sm:$0xff] }
  0x14   : > { %v221_v17 = vld [vmem:[%s621_s20 + $0x28] sm:$0xff]  ;;  %v313_v19 = vmul.f32 %v217_v14, %v217_v14  ;;  %v316_v20 = vmul.f32 %v220_v16, %v220_v16  ;;  %vm250_vm0 = vcmp.eq.s32.totalorder %v626_v8, %v609_v1  ;;  %vm251_vm1 = vcmp.eq.s32.totalorder %v628_v9, %v609_v1  ;;  %v224_v28 = vld [vmem:[%s621_s20 + $0x40] sm:$0x1]  ;;  %v223_v36 = vld [vmem:[%s621_s20 + $0x38] sm:$0xff] }
  0x15   : > { %v317_v21 = vmul.f32 %v221_v17, %v221_v17  ;;  %v325_v22 = vadd.f32 %v315_v13, %v314_v12  ;;  %v284_v23 = vsel %vm250_vm0, %v216_v7, 0.0  ;;  %v285_v26 = vsel %vm251_vm1, %v217_v14, 0.0  ;;  %v225_v31 = vld [vmem:[%s621_s20 + $0x48] sm:$0x1] }
  0x16   : > { %v322_v25 = vadd.f32 %v313_v19, %v312_v15  ;;  %vm254_vm2 = vcmp.eq.s32.totalorder %v626_v8, %v631_v10  ;;  %vm255_vm3 = vcmp.eq.s32.totalorder %v628_v9, %v631_v10  ;;  %v294_v27 = vadd.f32 %v285_v26, %v284_v23  ;;  %v376_v19 = vld [vmem:[#allocation2] sm:$0xff] }
  0x17   : > { %326 = vadd.xlane.f32.xlu0 %v325_v22  ;;  %vm252_vm4 = vcmp.eq.s32.totalorder %v626_v8, %v634_v11  ;;  %v328_v29 = vadd.f32 %v317_v21, %v316_v20  ;;  %vm253_vm5 = vcmp.eq.s32.totalorder %v628_v9, %v634_v11  ;;  %v288_v32 = vsel %vm254_vm2, %v220_v16, 0.0  ;;  %v377_v21 = vld [vmem:[#allocation2 + $0x8] sm:$0xff] }
  0x18   : > { %323 = vadd.xlane.f32.xlu1 %v322_v25  ;;  %v286_v30 = vsel %vm252_vm4, %v218_v5, 0.0  ;;  %v289_v33 = vsel %vm255_vm3, %v221_v17, 0.0  ;;  %v287_v34 = vsel %vm253_vm5, %v219_v6, 0.0  ;;  %vm258_vm7 = vcmp.eq.s32.totalorder %v626_v8, %v650_v24 }
  0x19   : > { %vm256_vm8 = vcmp.eq.s32.totalorder %v626_v8, %v640_v18  ;;  %vm257_vm9 = vcmp.eq.s32.totalorder %v628_v9, %v640_v18  ;;  %vm259_vm10 = vcmp.eq.s32.totalorder %v628_v9, %v650_v24  ;;  %v292_v37 = vsel %vm258_vm7, %v224_v28, 0.0 }
  0x1a   : > { %v297_v38 = vadd.f32 %v287_v34, %v286_v30  ;;  %v293_v39 = vsel %vm259_vm10, %v225_v31, 0.0  ;;  %v300_v40 = vadd.f32 %v289_v33, %v288_v32  ;;  %v307_v41 = vsel %vm306_vm6, %v292_v37, 0.0 }
  0x1b   : > { %295 = vadd.xlane.f32.xlu0 %v294_v27  ;;  %v308_v42 = vsel %vm306_vm6, %v293_v39, 0.0  ;;  %v290_v43 = vsel %vm256_vm8, %v222_v35, 0.0  ;;  %v291_v44 = vsel %vm257_vm9, %v223_v36, 0.0  ;;  %v320_v45 = vmul.f32 %v224_v28, %v224_v28  ;;  %v380_v39 = vld [vmem:[#allocation2 + $0x20] sm:$0x1] }
  0x1c   : > { %329 = vadd.xlane.f32.xlu1 %v328_v29  ;;  %v321_v46 = vmul.f32 %v225_v31, %v225_v31  ;;  %v309_v47 = vadd.f32 %v308_v42, %v307_v41  ;;  %v318_v48 = vmul.f32 %v222_v35, %v222_v35  ;;  %v319_v49 = vmul.f32 %v223_v36, %v223_v36  ;;  %v378_v29 = vld [vmem:[#allocation2 + $0x10] sm:$0xff]  ;;  %v379_v31 = vld [vmem:[#allocation2 + $0x18] sm:$0xff] }
  0x1d   : > { %v303_v50 = vadd.f32 %v291_v44, %v290_v43  ;;  %v334_v51 = vsel %vm306_vm6, %v320_v45, 0.0  ;;  %v510_v56 = vsel %vm250_vm0, 1.0, %v573_v55  ;;  %v511_v57 = vsel %vm251_vm1, 1.0, %v573_v55 }
  0x1e   : > { %v335_v52 = vsel %vm306_vm6, %v321_v46, 0.0  ;;  %v331_v53 = vadd.f32 %v319_v49, %v318_v48  ;;  %v512_v58 = vsel %vm252_vm4, 1.0, %v573_v55  ;;  %v513_v59 = vsel %vm253_vm5, 1.0, %v573_v55 }
  0x1f   : > { %298 = vadd.xlane.f32.xlu0 %v297_v38  ;;  %v336_v54 = vadd.f32 %v335_v52, %v334_v51  ;;  %v359_v60 = vadd.f32 %v511_v57, %v510_v56  ;;  %v362_v61 = vadd.f32 %v513_v59, %v512_v58  ;;  %v514_v62 = vsel %vm254_vm2, 1.0, %v573_v55 }
  0x20   : > { %301 = vadd.xlane.f32.xlu1 %v300_v40  ;;  %v515_v63 = vsel %vm255_vm3, 1.0, %v573_v55  ;;  %v516_v0 = vsel %vm256_vm8, 1.0, %v573_v55  ;;  %v517_v1 = vsel %vm257_vm9, 1.0, %v573_v55  ;;  %v518_v2 = vsel %vm258_vm7, 1.0, %v573_v55 }
  0x21   : > { %v519_v3 = vsel %vm259_vm10, 1.0, %v573_v55  ;;  %v365_v4 = vadd.f32 %v515_v63, %v514_v62  ;;  %v368_v5 = vadd.f32 %v517_v1, %v516_v0  ;;  %v371_v6 = vsel %vm306_vm6, %v518_v2, 0.0 }
  0x22   : > { %v372_v7 = vsel %vm306_vm6, %v519_v3, 0.0 }
  0x23   : > { %310 = vadd.xlane.f32.xlu0 %v309_v47  ;;  %v373_v10 = vadd.f32 %v372_v7, %v371_v6 }
  0x24   : > { %304 = vadd.xlane.f32.xlu1 %v303_v50 }
  0x27   : > { %332 = vadd.xlane.f32.xlu0 %v331_v53 }
  0x28   : > { %337 = vadd.xlane.f32.xlu1 %v336_v54 }
  0x2b   : > { %360 = vadd.xlane.f32.xlu0 %v359_v60 }
  0x2c   : > { %363 = vadd.xlane.f32.xlu1 %v362_v61 }
  0x2f   : > { %366 = vadd.xlane.f32.xlu0 %v365_v4 }
  0x30   : > { %369 = vadd.xlane.f32.xlu1 %v368_v5 }
  0x33   : > { %374 = vadd.xlane.f32.xlu0 %v373_v10 }
  0xa4   : > { %v327_v8 = vpop.xlane.xlu0 %326 }
  0xa5   : > { %v324_v9 = vpop.xlane.xlu1 %323 }
  0xa8   : > { %v296_v11 = vpop.xlane.xlu0 %295 }
  0xa9   : > { %v330_v12 = vpop.xlane.xlu1 %329  ;;  %v382_v20 = vsel %vm381_vm13, %v296_v11, %v324_v9 }
  0xac   : > { %v299_v13 = vpop.xlane.xlu0 %298 }
  0xad   : > { %v302_v14 = vpop.xlane.xlu1 %301  ;;  %v383_v23 = vsel %vm381_vm13, %v299_v13, %v327_v8 }
  0xae   : > { %v384_v30 = vsel %vm381_vm13, %v302_v14, %v330_v12 }
  0xb0   : > { %v311_v15 = vpop.xlane.xlu0 %310 }
  0xb1   : > { %v305_v16 = vpop.xlane.xlu1 %304 }
  0xb4   : > { %v333_v17 = vpop.xlane.xlu0 %332 }
  0xb5   : > { %v338_v18 = vpop.xlane.xlu1 %337  ;;  %v385_v33 = vsel %vm381_vm13, %v305_v16, %v333_v17 }
  0xb6   : > { %v386_v40 = vsel %vm381_vm13, %v311_v15, %v338_v18 }
  0xb8   : > { %v361_v22 = vpop.xlane.xlu0 %360 }
  0xb9   : > { %v364_v24 = vpop.xlane.xlu1 %363  ;;  %v388_v25 = vsel %vm387_vm14, %v382_v20, %v361_v22 }
  0xba   : > { %v389_v26 = vsel %vm387_vm14, %v383_v23, %v364_v24  ;;  %v393_v27 = vadd.f32 %v388_v25, %v376_v19 }
  0xbb   : > { %v394_v28 = vadd.f32 %v389_v26, %v377_v21 }
  0xbc   : > { %399 = vst.msk [vmem:[#allocation2] sm:$0xff] %vm209_vm11, %v393_v27  ;;  %v367_v32 = vpop.xlane.xlu0 %366 }
  0xbd   : > { %400 = vst.msk [vmem:[#allocation2 + $0x8] sm:$0xff] %vm209_vm11, %v394_v28  ;;  %v370_v34 = vpop.xlane.xlu1 %369  ;;  %v390_v35 = vsel %vm387_vm14, %v384_v30, %v367_v32 }
  0xbe   : > { %v391_v36 = vsel %vm387_vm14, %v385_v33, %v370_v34  ;;  %v395_v37 = vadd.f32 %v390_v35, %v378_v29 }
  0xbf   : > { %v396_v38 = vadd.f32 %v391_v36, %v379_v31 }
  0xc0   : > { %401 = vst.msk [vmem:[#allocation2 + $0x10] sm:$0xff] %vm209_vm11, %v395_v37  ;;  %v375_v41 = vpop.xlane.xlu0 %374 }
  0xc1   : > { %402 = vst.msk [vmem:[#allocation2 + $0x18] sm:$0xff] %vm209_vm11, %v396_v38  ;;  %v392_v42 = vsel %vm387_vm14, %v386_v40, %v375_v41 }
  0xc2   : > { %v397_v43 = vadd.f32 %v392_v42, %v380_v39 }
  0xc3   : > { %v408_v44 = vld [vmem:[#allocation2] sm:$0xff] }
  0xc4   : > { %v409_v45 = vld [vmem:[#allocation2 + $0x8] sm:$0xff]  ;;  %413 = vst.msk [vmem:[%s204_s24] sm:$0xff] %vm209_vm11, %v408_v44 }
  0xc5   : > { %404 = vst.msk [vmem:[#allocation2 + $0x20] sm:$0x1] %vm214_vm12, %v397_v43 }
  0xc6   : > { %414 = vst.msk [vmem:[%s204_s24 + $0x8] sm:$0xff] %vm209_vm11, %v409_v45 }
  0xc7   : > { %v410_v46 = vld [vmem:[#allocation2 + $0x10] sm:$0xff] }
  0xc8   : > { %v411_v47 = vld [vmem:[#allocation2 + $0x18] sm:$0xff]  ;;  %415 = vst.msk [vmem:[%s204_s24 + $0x10] sm:$0xff] %vm209_vm11, %v410_v46 }
  0xc9   : > { %416 = vst.msk [vmem:[%s204_s24 + $0x18] sm:$0xff] %vm209_vm11, %v411_v47 }
  0xcc   : > { %v412_v48 = vld [vmem:[#allocation2 + $0x20] sm:$0x1] }
  0xcd   : > { %417 = vst.msk [vmem:[%s204_s24 + $0x20] sm:$0x1] %vm214_vm12, %v412_v48 }
  0xce PF: > { %s12_s11 = sadd.s32 1, %s571_s11   ;;  %s776_s9 = smov %s567_s10 }
  0xcf   : > { %p9_p5 = scmp.ge.s32.totalorder %s12_s11, 4   ;;  %s777_s10 = smov %s779_s12 }
  0xd1   :  { %11 = sbr.rel (!%p9_p5) target bundleno = 2 (0x2), region = 69 }

</bundles_post_ra>
